<compile_context>
chip_gen: v7x
topology: tpu7x:2x2x1
jax: 0.10.0
libtpu: 0.0.40
codegen_flags: <defaults>
</compile_context>

<pallas_src>
import functools

import jax
import jax.numpy as jnp
from jax import lax
from jax.experimental import pallas as pl
from jax.experimental.pallas import tpu as pltpu

ALPHA = 2.0            # erosion rate exponent (module default)
K_ITERS = 10           # number of erosion iterations (module default)
LANE = 128
TARGET_L = 512         # preferred lane width per block (multiple of 128)
MAX_BLOCK_ELEMS = 128 * 1024   # cap H*L per f32 working array (~0.5 MiB)


# ----------------------------- roll helpers (crash fix) -----------------------------
def _roll_lanes(v, shift):
    """Static lane rotation with non-negative shift and explicit positive axis."""
    size = v.shape[-1]
    s = shift % size
    if s == 0:
        return v
    return pltpu.roll(v, shift=s, axis=v.ndim - 1)


def _roll_sublanes(v, shift):
    """Static sublane rotation (axis 0 of a 2-D (H, L) array)."""
    size = v.shape[0]
    s = shift % size
    if s == 0:
        return v
    return pltpu.roll(v, shift=s, axis=0)


# ----------------------------------- kernel body ------------------------------------
def _make_kernel(H, W, L, out_row):
    """Per-block erosion kernel.

    Each block is (1, H, L) with L = multiple of 128: G images side-by-side along the lane
    axis (image j owns lanes [j*W, (j+1)*W)), plus neutralized padding lanes at the end.
    """
    steps = []
    s = 1
    while s < W:
        steps.append(s)
        s *= 2

    def kernel(pred_ref, tgt_ref, meta_ref, out_ref):
        x = pred_ref[0].astype(jnp.float32)        # (H, L)
        t = tgt_ref[0].astype(jnp.float32)         # (H, L) binarized per channel
        meta = meta_ref[...]                       # (2, L) int32
        grp = meta[0:1, :]                         # image id per lane (-1 for padding)
        col = meta[1:2, :]                         # column within image (-7 for padding)

        bound0 = (x - t) ** 2

        # ---- loop-invariant masks (hoisted; derived with the same roll primitive used on
        #      the data, so correctness does not depend on the roll direction convention) ----
        xmask_p = (_roll_lanes(grp, 1) == grp) & (jnp.abs(_roll_lanes(col, 1) - col) == 1)
        xmask_m = (_roll_lanes(grp, -1) == grp) & (jnp.abs(_roll_lanes(col, -1) - col) == 1)

        rows = lax.broadcasted_iota(jnp.int32, (H, L), 0)
        ymask_p = jnp.abs(_roll_sublanes(rows, 1) - rows) == 1
        ymask_m = jnp.abs(_roll_sublanes(rows, -1) - rows) == 1

        grp_masks = [(d, _roll_lanes(grp, d) == grp, _roll_lanes(grp, -d) == grp)
                     for d in steps]

        def group_allreduce_max(r):
            # Within-image (W contiguous lanes) all-reduce by masked distance doubling.
            for d, mp, mm in grp_masks:
                a = jnp.where(mp, _roll_lanes(r, d), r)
                b = jnp.where(mm, _roll_lanes(r, -d), r)
                r = jnp.maximum(jnp.maximum(r, a), b)
            return r

        def body(k, carry):
            bound, eroded = carry
            # 0.2 * cross-kernel conv2d with zero padding (all stencil taps via XLU rolls).
            ysum = bound
            ysum = ysum + jnp.where(ymask_p, _roll_sublanes(bound, 1), 0.0)
            ysum = ysum + jnp.where(ymask_m, _roll_sublanes(bound, -1), 0.0)
            xl = jnp.where(xmask_p, _roll_lanes(bound, 1), 0.0)
            xr = jnp.where(xmask_m, _roll_lanes(bound, -1), 0.0)
            dilation = 0.2 * (ysum + xl + xr)
            erosion = jnp.maximum(dilation - 0.5, 0.0)

            # Per-image max / min (AdaptiveMaxPool2d(1)), fused into one (2, L) all-reduce.
            rmax = jnp.max(erosion, axis=0, keepdims=True)
            rmin = jnp.min(erosion, axis=0, keepdims=True)
            red = group_allreduce_max(jnp.concatenate([rmax, -rmin], axis=0))
            img_max = red[0:1, :]
            img_min = -red[1:2, :]
            denom = img_max - img_min
            needs = denom != 0.0
            inv = pl.reciprocal(jnp.where(needs, denom, 1.0), approx=False)   # exact
            erosion = jnp.where(needs, (erosion - img_min) * inv, erosion)

            kf = lax.convert_element_type(k + 1, jnp.float32)
            wk = kf * kf if ALPHA == 2.0 else kf ** jnp.float32(ALPHA)
            return erosion, eroded + erosion * wk

        # fori_loop, manually unrolled by 2 (bounds live ranges, lets LLO overlap pairs).
        def body2(i, carry):
            return body(2 * i + 1, body(2 * i, carry))

        carry = (bound0, jnp.zeros_like(bound0))
        carry = lax.fori_loop(0, K_ITERS // 2, body2, carry)
        if K_ITERS % 2:
            carry = body(K_ITERS - 1, carry)
        eroded = carry[1]

        if out_row:
            out_ref[0] = jnp.sum(eroded, axis=0, keepdims=True)
        else:
            out_ref[0] = eroded.astype(out_ref.dtype)

    return kernel


# ------------------------------- packing helpers (XLA) -------------------------------
def _choose_packing(H, W, n_img):
    target_l = min(TARGET_L, max(LANE, (MAX_BLOCK_ELEMS // max(H, 1)) // LANE * LANE))
    g = max(1, min(target_l // W, n_img))
    l = -(-(g * W) // LANE) * LANE          # lane width padded to a multiple of 128
    return g, l


def _pack_images(imgs, g, l):
    """(N, H, W) -> (ceil(N/g), H, l): g images side-by-side, lane-padded to l."""
    n, h, w = imgs.shape
    nb = -(-n // g)
    pad_imgs = nb * g - n
    if pad_imgs:
        imgs = jnp.concatenate([imgs, jnp.zeros((pad_imgs, h, w), imgs.dtype)], axis=0)
    packed = imgs.reshape(nb, g, h, w).transpose(0, 2, 1, 3).reshape(nb, h, g * w)
    lane_pad = l - g * w
    if lane_pad:
        packed = jnp.concatenate(
            [packed, jnp.zeros((nb, h, lane_pad), imgs.dtype)], axis=-1)
    return packed


def _unpack_images(packed, n, h, w, g):
    nb = packed.shape[0]
    core = packed[:, :, : g * w]
    return core.reshape(nb, h, g, w).transpose(0, 2, 1, 3).reshape(nb * g, h, w)[:n]


def _lane_meta(W, g, l):
    """(2, l) int32: row0 = image id per lane (-1 for padding), row1 = column (-7 for padding)."""
    gidx = jnp.repeat(jnp.arange(g, dtype=jnp.int32), W)
    cidx = jnp.tile(jnp.arange(W, dtype=jnp.int32), g)
    pad = l - g * W
    if pad:
        gidx = jnp.concatenate([gidx, jnp.full((pad,), -1, jnp.int32)])
        cidx = jnp.concatenate([cidx, jnp.full((pad,), -7, jnp.int32)])
    return jnp.stack([gidx, cidx], axis=0)


# --------------------------------- host-side wrapper ---------------------------------
@functools.partial(jax.jit, static_argnames=("reduction",))
def _hausdorff_er_pallas(pred, target, reduction):
    B, C, H, W = pred.shape
    n_img = C * B
    G, L = _choose_packing(H, W, n_img)

    # Binarize the target per channel once in the wrapper (assumes integer-valued labels
    # in [0, C-1], like the torch module).
    classes = jnp.arange(C, dtype=target.dtype).reshape(1, C, 1, 1)
    tgt_oh = (target == classes).astype(pred.dtype)                 # (B, C, H, W)

    # Channel-major flattening so the 'none' output is directly (C, B, 1, H, W).
    pred_f = pred.transpose(1, 0, 2, 3).reshape(n_img, H, W)
    tgt_f = tgt_oh.transpose(1, 0, 2, 3).reshape(n_img, H, W)

    pred_p = _pack_images(pred_f, G, L)          # (nb, H, L) lane-dense slabs
    tgt_p = _pack_images(tgt_f, G, L)
    meta = _lane_meta(W, G, L)                   # (2, L)
    nb = pred_p.shape[0]

    in_specs = [
        pl.BlockSpec((1, H, L), lambda i: (i, 0, 0)),
        pl.BlockSpec((1, H, L), lambda i: (i, 0, 0)),
        pl.BlockSpec((2, L), lambda i: (0, 0)),
    ]
    cparams = pltpu.CompilerParams(
        dimension_semantics=("parallel",),
        vmem_limit_bytes=48 * 1024 * 1024)

    if reduction == "none":
        out_p = pl.pallas_call(
            _make_kernel(H, W, L, out_row=False),
            out_shape=jax.ShapeDtypeStruct((nb, H, L), pred.dtype),
            grid_spec=pltpu.PrefetchScalarGridSpec(
                num_scalar_prefetch=0,
                grid=(nb,),
                in_specs=in_specs,
                out_specs=pl.BlockSpec((1, H, L), lambda i: (i, 0, 0))),
            compiler_params=cparams,
        )(pred_p, tgt_p, meta)
        out_f = _unpack_images(out_p, n_img, H, W, G)               # (C*B, H, W)
        return out_f.reshape(C, B, 1, H, W)

    # 'mean' / 'sum': each block emits a (1, L) partial-sum row (padding lanes and dummy
    # images contribute exactly 0); grid stays 'parallel', XLA does the final tiny sum.
    rows = pl.pallas_call(
        _make_kernel(H, W, L, out_row=True),
        out_shape=jax.ShapeDtypeStruct((nb, 1, L), jnp.float32),
        grid_spec=pltpu.PrefetchScalarGridSpec(
            num_scalar_prefetch=0,
            grid=(nb,),
            in_specs=in_specs,
            out_specs=pl.BlockSpec((1, 1, L), lambda i: (i, 0, 0))),
        compiler_params=cparams,
    )(pred_p, tgt_p, meta)
    total = jnp.sum(rows)
    if reduction == "sum":
        return total.astype(pred.dtype)
    return (total / (C * B * H * W)).astype(pred.dtype)


def hausdorff_er_loss(pred, target, reduction="mean"):
    """Forward pass of _HausdorffERLossBase (2-D cross kernel, alpha=2, k=10)."""
    if not (pred.shape[2:] == target.shape[2:]
            and pred.shape[0] == target.shape[0]
            and target.shape[1] == 1):
        raise ValueError(
            "Prediction and target need to be of same size, and target should not be "
            f"one-hot. Got {pred.shape} and {target.shape}.")
    if reduction not in ("mean", "sum", "none"):
        raise NotImplementedError(f"reduction `{reduction}` has not been implemented yet.")
    # NOTE: the torch module also checks `pred.size(1) < target.max().item()`; that forces
    # a device->host sync on every call, so it is intentionally omitted.  Target values are
    # assumed to be integer-valued in [0, C-1].
    return _hausdorff_er_pallas(pred, target, reduction)


# ---------------- pure-JAX reference (faithful translation, for verification) ----------------
def _ref_cross_dilation(b):
    H, W = b.shape
    zrow = jnp.zeros((1, W), b.dtype)
    zcol = jnp.zeros((H, 1), b.dtype)
    up = jnp.concatenate([b[1:, :], zrow], axis=0)
    down = jnp.concatenate([zrow, b[:-1, :]], axis=0)
    left = jnp.concatenate([b[:, 1:], zcol], axis=1)
    right = jnp.concatenate([zcol, b[:, :-1]], axis=1)
    return 0.2 * (b + up + down + left + right)


def _ref_perform_erosion(bound):
    eroded = jnp.zeros_like(bound)
    for k in range(K_ITERS):
        d = _ref_cross_dilation(bound)
        e = jnp.maximum(d - 0.5, 0.0)
        emax = jnp.max(e)
        emin = jnp.min(e)
        denom = emax - emin
        e = jnp.where(denom != 0.0,
                      (e - emin) / jnp.where(denom != 0.0, denom, 1.0), e)
        eroded = eroded + e * (float(k + 1) ** ALPHA)
        bound = e
    return eroded


def _ref_loss_none(pred, target):
    B, C, H, W = pred.shape
    chans = []
    for i in range(C):
        per_b = []
        for b in range(B):
            tgt_bin = (target[b, 0] == i).astype(pred.dtype)
            bound = (pred[b, i] - tgt_bin) ** 2
            per_b.append(_ref_perform_erosion(bound))
        chans.append(jnp.stack(per_b)[:, None])
    return jnp.stack(chans)  # (C, B, 1, H, W)


if __name__ == "__main__":
    key = jax.random.PRNGKey(0)
    kp, kt = jax.random.split(key)
    B, C, H, W = 2, 4, 16, 16

    pred = jax.nn.sigmoid(jax.random.normal(kp, (B, C, H, W), dtype=jnp.float32))
    target = jax.random.randint(kt, (B, 1, H, W), 0, C).astype(jnp.float32)

    out_none = jax.block_until_ready(hausdorff_er_loss(pred, target, reduction="none"))
    loss_mean = jax.block_until_ready(hausdorff_er_loss(pred, target, reduction="mean"))
    loss_sum = jax.block_until_ready(hausdorff_er_loss(pred, target, reduction="sum"))

    ref_none = _ref_loss_none(pred, target)
    assert out_none.shape == (C, B, 1, H, W), out_none.shape
    assert jnp.allclose(out_none, ref_none, rtol=2e-4, atol=2e-4), "none-reduction mismatch"
    assert jnp.allclose(loss_mean, jnp.mean(ref_none), rtol=2e-4, atol=2e-4), "mean mismatch"
    assert jnp.allclose(loss_sum, jnp.sum(ref_none), rtol=2e-4, atol=2e-4), "sum mismatch"

    print("KERNEL_OK")
</pallas_src>

<mosaic_0001>
module attributes {stable_mosaic.version = 11 : i64} {
  func.func @kernel(%arg0: i32, %arg1: memref<1x16x128xf32, #tpu.memory_space<vmem>>, %arg2: memref<1x16x128xf32, #tpu.memory_space<vmem>>, %arg3: memref<2x128xi32, #tpu.memory_space<vmem>>, %arg4: memref<1x16x128xf32, #tpu.memory_space<vmem>>) attributes {dimension_semantics = [#tpu.dimension_semantics<parallel>], iteration_bounds = array<i64: 1>, scalar_prefetch = 0 : i64, scratch_operands = 0 : i64, tpu.core_type = #tpu.core_type<tc>, window_params = [{transform_indices = @transform_0, window_bounds = array<i64: 1, 16, 128>}, {transform_indices = @transform_1, window_bounds = array<i64: 1, 16, 128>}, {pipeline_mode = #tpu.pipeline_mode<synchronous>, transform_indices = @transform_2, window_bounds = array<i64: 2, 128>}, {transform_indices = @transform_3, window_bounds = array<i64: 1, 16, 128>}]} {
    %c0 = arith.constant 0 : index
    %c0_0 = arith.constant 0 : index
    %c0_1 = arith.constant 0 : index
    %0 = vector.load %arg1[%c0, %c0_0, %c0_1] : memref<1x16x128xf32, #tpu.memory_space<vmem>>, vector<1x16x128xf32>
    %1 = vector.shape_cast %0 : vector<1x16x128xf32> to vector<16x128xf32>
    %c0_2 = arith.constant 0 : index
    %c0_3 = arith.constant 0 : index
    %c0_4 = arith.constant 0 : index
    %2 = vector.load %arg2[%c0_2, %c0_3, %c0_4] : memref<1x16x128xf32, #tpu.memory_space<vmem>>, vector<1x16x128xf32>
    %3 = vector.shape_cast %2 : vector<1x16x128xf32> to vector<16x128xf32>
    %c0_5 = arith.constant 0 : index
    %c0_6 = arith.constant 0 : index
    %4 = vector.load %arg3[%c0_5, %c0_6] : memref<2x128xi32, #tpu.memory_space<vmem>>, vector<2x128xi32>
    %5 = vector.extract_strided_slice %4 {offsets = [0, 0], sizes = [1, 128], strides = [1, 1]} : vector<2x128xi32> to vector<1x128xi32>
    %6 = vector.extract_strided_slice %4 {offsets = [1, 0], sizes = [1, 128], strides = [1, 1]} : vector<2x128xi32> to vector<1x128xi32>
    %7 = arith.subf %1, %3 : vector<16x128xf32>
    %8 = arith.mulf %7, %7 : vector<16x128xf32>
    %c1_i32 = arith.constant 1 : i32
    %9 = tpu.dynamic_rotate %5 by %c1_i32 dim 1 : vector<1x128xi32>, i32 -> vector<1x128xi32>
    %10 = arith.cmpi eq, %9, %5 : vector<1x128xi32>
    %c1_i32_7 = arith.constant 1 : i32
    %11 = tpu.dynamic_rotate %6 by %c1_i32_7 dim 1 : vector<1x128xi32>, i32 -> vector<1x128xi32>
    %12 = arith.subi %11, %6 : vector<1x128xi32>
    %13 = math.absi %12 : vector<1x128xi32>
    %c1_i32_8 = arith.constant 1 : i32
    %14 = vector.broadcast %c1_i32_8 : i32 to vector<1x128xi32>
    %15 = arith.cmpi eq, %13, %14 : vector<1x128xi32>
    %16 = arith.andi %10, %15 : vector<1x128xi1>
    %c127_i32 = arith.constant 127 : i32
    %17 = tpu.dynamic_rotate %5 by %c127_i32 dim 1 : vector<1x128xi32>, i32 -> vector<1x128xi32>
    %18 = arith.cmpi eq, %17, %5 : vector<1x128xi32>
    %c127_i32_9 = arith.constant 127 : i32
    %19 = tpu.dynamic_rotate %6 by %c127_i32_9 dim 1 : vector<1x128xi32>, i32 -> vector<1x128xi32>
    %20 = arith.subi %19, %6 : vector<1x128xi32>
    %21 = math.absi %20 : vector<1x128xi32>
    %c1_i32_10 = arith.constant 1 : i32
    %22 = vector.broadcast %c1_i32_10 : i32 to vector<1x128xi32>
    %23 = arith.cmpi eq, %21, %22 : vector<1x128xi32>
    %24 = arith.andi %18, %23 : vector<1x128xi1>
    %25 = tpu.iota {dimensions = array<i32: 0>} : vector<16x128xi32>
    %c1_i32_11 = arith.constant 1 : i32
    %26 = tpu.dynamic_rotate %25 by %c1_i32_11 dim 0 : vector<16x128xi32>, i32 -> vector<16x128xi32>
    %27 = arith.subi %26, %25 : vector<16x128xi32>
    %28 = math.absi %27 : vector<16x128xi32>
    %c1_i32_12 = arith.constant 1 : i32
    %29 = vector.broadcast %c1_i32_12 : i32 to vector<16x128xi32>
    %30 = arith.cmpi eq, %28, %29 : vector<16x128xi32>
    %c15_i32 = arith.constant 15 : i32
    %31 = tpu.dynamic_rotate %25 by %c15_i32 dim 0 : vector<16x128xi32>, i32 -> vector<16x128xi32>
    %32 = arith.subi %31, %25 : vector<16x128xi32>
    %33 = math.absi %32 : vector<16x128xi32>
    %c1_i32_13 = arith.constant 1 : i32
    %34 = vector.broadcast %c1_i32_13 : i32 to vector<16x128xi32>
    %35 = arith.cmpi eq, %33, %34 : vector<16x128xi32>
    %c1_i32_14 = arith.constant 1 : i32
    %36 = tpu.dynamic_rotate %5 by %c1_i32_14 dim 1 : vector<1x128xi32>, i32 -> vector<1x128xi32>
    %37 = arith.cmpi eq, %36, %5 : vector<1x128xi32>
    %c127_i32_15 = arith.constant 127 : i32
    %38 = tpu.dynamic_rotate %5 by %c127_i32_15 dim 1 : vector<1x128xi32>, i32 -> vector<1x128xi32>
    %39 = arith.cmpi eq, %38, %5 : vector<1x128xi32>
    %c2_i32 = arith.constant 2 : i32
    %40 = tpu.dynamic_rotate %5 by %c2_i32 dim 1 : vector<1x128xi32>, i32 -> vector<1x128xi32>
    %41 = arith.cmpi eq, %40, %5 : vector<1x128xi32>
    %c126_i32 = arith.constant 126 : i32
    %42 = tpu.dynamic_rotate %5 by %c126_i32 dim 1 : vector<1x128xi32>, i32 -> vector<1x128xi32>
    %43 = arith.cmpi eq, %42, %5 : vector<1x128xi32>
    %c4_i32 = arith.constant 4 : i32
    %44 = tpu.dynamic_rotate %5 by %c4_i32 dim 1 : vector<1x128xi32>, i32 -> vector<1x128xi32>
    %45 = arith.cmpi eq, %44, %5 : vector<1x128xi32>
    %c124_i32 = arith.constant 124 : i32
    %46 = tpu.dynamic_rotate %5 by %c124_i32 dim 1 : vector<1x128xi32>, i32 -> vector<1x128xi32>
    %47 = arith.cmpi eq, %46, %5 : vector<1x128xi32>
    %c8_i32 = arith.constant 8 : i32
    %48 = tpu.dynamic_rotate %5 by %c8_i32 dim 1 : vector<1x128xi32>, i32 -> vector<1x128xi32>
    %49 = arith.cmpi eq, %48, %5 : vector<1x128xi32>
    %c120_i32 = arith.constant 120 : i32
    %50 = tpu.dynamic_rotate %5 by %c120_i32 dim 1 : vector<1x128xi32>, i32 -> vector<1x128xi32>
    %51 = arith.cmpi eq, %50, %5 : vector<1x128xi32>
    %cst = arith.constant 0.000000e+00 : f32
    %52 = vector.broadcast %cst : f32 to vector<16x128xf32>
    %c0_i32 = arith.constant 0 : i32
    %c5_i32 = arith.constant 5 : i32
    %53 = arith.addi %c0_i32, %c5_i32 : i32
    %c1_i32_16 = arith.constant 1 : i32
    %54:2 = scf.for %arg5 = %c0_i32 to %53 step %c1_i32_16 iter_args(%arg6 = %8, %arg7 = %52) -> (vector<16x128xf32>, vector<16x128xf32>)  : i32 {
      %c2_i32_21 = arith.constant 2 : i32
      %58 = arith.muli %c2_i32_21, %arg5 : i32
      %c1_i32_22 = arith.constant 1 : i32
      %59 = arith.addi %58, %c1_i32_22 : i32
      %c2_i32_23 = arith.constant 2 : i32
      %60 = arith.muli %c2_i32_23, %arg5 : i32
      %c1_i32_24 = arith.constant 1 : i32
      %61 = tpu.dynamic_rotate %arg6 by %c1_i32_24 dim 0 : vector<16x128xf32>, i32 -> vector<16x128xf32>
      %cst_25 = arith.constant 0.000000e+00 : f32
      %62 = vector.broadcast %cst_25 : f32 to vector<16x128xf32>
      %63 = arith.select %30, %61, %62 : vector<16x128xi1>, vector<16x128xf32>
      %64 = arith.addf %arg6, %63 : vector<16x128xf32>
      %c15_i32_26 = arith.constant 15 : i32
      %65 = tpu.dynamic_rotate %arg6 by %c15_i32_26 dim 0 : vector<16x128xf32>, i32 -> vector<16x128xf32>
      %cst_27 = arith.constant 0.000000e+00 : f32
      %66 = vector.broadcast %cst_27 : f32 to vector<16x128xf32>
      %67 = arith.select %35, %65, %66 : vector<16x128xi1>, vector<16x128xf32>
      %68 = arith.addf %64, %67 : vector<16x128xf32>
      %c1_i32_28 = arith.constant 1 : i32
      %69 = tpu.dynamic_rotate %arg6 by %c1_i32_28 dim 1 : vector<16x128xf32>, i32 -> vector<16x128xf32>
      %cst_29 = arith.constant 0.000000e+00 : f32
      %70 = vector.shape_cast %16 : vector<1x128xi1> to vector<1x128xi1>
      %71 = vector.broadcast %70 : vector<1x128xi1> to vector<16x128xi1>
      %72 = vector.broadcast %cst_29 : f32 to vector<16x128xf32>
      %73 = arith.select %71, %69, %72 : vector<16x128xi1>, vector<16x128xf32>
      %c127_i32_30 = arith.constant 127 : i32
      %74 = tpu.dynamic_rotate %arg6 by %c127_i32_30 dim 1 : vector<16x128xf32>, i32 -> vector<16x128xf32>
      %cst_31 = arith.constant 0.000000e+00 : f32
      %75 = vector.shape_cast %24 : vector<1x128xi1> to vector<1x128xi1>
      %76 = vector.broadcast %75 : vector<1x128xi1> to vector<16x128xi1>
      %77 = vector.broadcast %cst_31 : f32 to vector<16x128xf32>
      %78 = arith.select %76, %74, %77 : vector<16x128xi1>, vector<16x128xf32>
      %79 = arith.addf %68, %73 : vector<16x128xf32>
      %80 = arith.addf %79, %78 : vector<16x128xf32>
      %cst_32 = arith.constant 2.000000e-01 : f32
      %81 = vector.broadcast %cst_32 : f32 to vector<16x128xf32>
      %82 = arith.mulf %81, %80 : vector<16x128xf32>
      %cst_33 = arith.constant 5.000000e-01 : f32
      %83 = vector.broadcast %cst_33 : f32 to vector<16x128xf32>
      %84 = arith.subf %82, %83 : vector<16x128xf32>
      %cst_34 = arith.constant 0.000000e+00 : f32
      %85 = vector.broadcast %cst_34 : f32 to vector<16x128xf32>
      %86 = arith.maximumf %84, %85 : vector<16x128xf32>
      %cst_35 = arith.constant dense<0xFF800000> : vector<128xf32>
      %87 = vector.multi_reduction <maximumf>, %86, %cst_35 [0] : vector<16x128xf32> to vector<128xf32>
      %88 = vector.shape_cast %87 : vector<128xf32> to vector<1x128xf32>
      %cst_36 = arith.constant dense<0x7F800000> : vector<128xf32>
      %89 = vector.multi_reduction <minimumf>, %86, %cst_36 [0] : vector<16x128xf32> to vector<128xf32>
      %90 = vector.shape_cast %89 : vector<128xf32> to vector<1x128xf32>
      %cst_37 = arith.constant 0.000000e+00 : f32
      %91 = vector.broadcast %cst_37 : f32 to vector<1x128xf32>
      %92 = arith.subf %91, %90 : vector<1x128xf32>
      %93 = tpu.concatenate %88, %92 in 0 : vector<1x128xf32>, vector<1x128xf32> -> vector<2x128xf32>
      %c1_i32_38 = arith.constant 1 : i32
      %94 = tpu.dynamic_rotate %93 by %c1_i32_38 dim 1 : vector<2x128xf32>, i32 -> vector<2x128xf32>
      %95 = vector.shape_cast %37 : vector<1x128xi1> to vector<1x128xi1>
      %96 = vector.broadcast %95 : vector<1x128xi1> to vector<2x128xi1>
      %97 = arith.select %96, %94, %93 : vector<2x128xi1>, vector<2x128xf32>
      %c127_i32_39 = arith.constant 127 : i32
      %98 = tpu.dynamic_rotate %93 by %c127_i32_39 dim 1 : vector<2x128xf32>, i32 -> vector<2x128xf32>
      %99 = vector.shape_cast %39 : vector<1x128xi1> to vector<1x128xi1>
      %100 = vector.broadcast %99 : vector<1x128xi1> to vector<2x128xi1>
      %101 = arith.select %100, %98, %93 : vector<2x128xi1>, vector<2x128xf32>
      %102 = arith.maximumf %93, %97 : vector<2x128xf32>
      %103 = arith.maximumf %102, %101 : vector<2x128xf32>
      %c2_i32_40 = arith.constant 2 : i32
      %104 = tpu.dynamic_rotate %103 by %c2_i32_40 dim 1 : vector<2x128xf32>, i32 -> vector<2x128xf32>
      %105 = vector.shape_cast %41 : vector<1x128xi1> to vector<1x128xi1>
      %106 = vector.broadcast %105 : vector<1x128xi1> to vector<2x128xi1>
      %107 = arith.select %106, %104, %103 : vector<2x128xi1>, vector<2x128xf32>
      %c126_i32_41 = arith.constant 126 : i32
      %108 = tpu.dynamic_rotate %103 by %c126_i32_41 dim 1 : vector<2x128xf32>, i32 -> vector<2x128xf32>
      %109 = vector.shape_cast %43 : vector<1x128xi1> to vector<1x128xi1>
      %110 = vector.broadcast %109 : vector<1x128xi1> to vector<2x128xi1>
      %111 = arith.select %110, %108, %103 : vector<2x128xi1>, vector<2x128xf32>
      %112 = arith.maximumf %103, %107 : vector<2x128xf32>
      %113 = arith.maximumf %112, %111 : vector<2x128xf32>
      %c4_i32_42 = arith.constant 4 : i32
      %114 = tpu.dynamic_rotate %113 by %c4_i32_42 dim 1 : vector<2x128xf32>, i32 -> vector<2x128xf32>
      %115 = vector.shape_cast %45 : vector<1x128xi1> to vector<1x128xi1>
      %116 = vector.broadcast %115 : vector<1x128xi1> to vector<2x128xi1>
      %117 = arith.select %116, %114, %113 : vector<2x128xi1>, vector<2x128xf32>
      %c124_i32_43 = arith.constant 124 : i32
      %118 = tpu.dynamic_rotate %113 by %c124_i32_43 dim 1 : vector<2x128xf32>, i32 -> vector<2x128xf32>
      %119 = vector.shape_cast %47 : vector<1x128xi1> to vector<1x128xi1>
      %120 = vector.broadcast %119 : vector<1x128xi1> to vector<2x128xi1>
      %121 = arith.select %120, %118, %113 : vector<2x128xi1>, vector<2x128xf32>
      %122 = arith.maximumf %113, %117 : vector<2x128xf32>
      %123 = arith.maximumf %122, %121 : vector<2x128xf32>
      %c8_i32_44 = arith.constant 8 : i32
      %124 = tpu.dynamic_rotate %123 by %c8_i32_44 dim 1 : vector<2x128xf32>, i32 -> vector<2x128xf32>
      %125 = vector.shape_cast %49 : vector<1x128xi1> to vector<1x128xi1>
      %126 = vector.broadcast %125 : vector<1x128xi1> to vector<2x128xi1>
      %127 = arith.select %126, %124, %123 : vector<2x128xi1>, vector<2x128xf32>
      %c120_i32_45 = arith.constant 120 : i32
      %128 = tpu.dynamic_rotate %123 by %c120_i32_45 dim 1 : vector<2x128xf32>, i32 -> vector<2x128xf32>
      %129 = vector.shape_cast %51 : vector<1x128xi1> to vector<1x128xi1>
      %130 = vector.broadcast %129 : vector<1x128xi1> to vector<2x128xi1>
      %131 = arith.select %130, %128, %123 : vector<2x128xi1>, vector<2x128xf32>
      %132 = arith.maximumf %123, %127 : vector<2x128xf32>
      %133 = arith.maximumf %132, %131 : vector<2x128xf32>
      %134 = vector.extract_strided_slice %133 {offsets = [0, 0], sizes = [1, 128], strides = [1, 1]} : vector<2x128xf32> to vector<1x128xf32>
      %135 = vector.extract_strided_slice %133 {offsets = [1, 0], sizes = [1, 128], strides = [1, 1]} : vector<2x128xf32> to vector<1x128xf32>
      %cst_46 = arith.constant 0.000000e+00 : f32
      %136 = vector.broadcast %cst_46 : f32 to vector<1x128xf32>
      %137 = arith.subf %136, %135 : vector<1x128xf32>
      %138 = arith.subf %134, %137 : vector<1x128xf32>
      %cst_47 = arith.constant 0.000000e+00 : f32
      %139 = vector.broadcast %cst_47 : f32 to vector<1x128xf32>
      %140 = arith.cmpf one, %138, %139 : vector<1x128xf32>
      %cst_48 = arith.constant 1.000000e+00 : f32
      %141 = vector.broadcast %cst_48 : f32 to vector<1x128xf32>
      %142 = arith.select %140, %138, %141 : vector<1x128xi1>, vector<1x128xf32>
      %143 = tpu.reciprocal %142 : vector<1x128xf32> -> vector<1x128xf32>
      %144 = vector.broadcast %137 : vector<1x128xf32> to vector<16x128xf32>
      %145 = arith.subf %86, %144 : vector<16x128xf32>
      %146 = vector.broadcast %143 : vector<1x128xf32> to vector<16x128xf32>
      %147 = arith.mulf %145, %146 : vector<16x128xf32>
      %148 = vector.shape_cast %140 : vector<1x128xi1> to vector<1x128xi1>
      %149 = vector.broadcast %148 : vector<1x128xi1> to vector<16x128xi1>
      %150 = arith.select %149, %147, %86 : vector<16x128xi1>, vector<16x128xf32>
      %c1_i32_49 = arith.constant 1 : i32
      %151 = arith.addi %60, %c1_i32_49 : i32
      %152 = arith.sitofp %151 : i32 to f32
      %153 = arith.mulf %152, %152 : f32
      %154 = vector.broadcast %153 : f32 to vector<16x128xf32>
      %155 = arith.mulf %150, %154 : vector<16x128xf32>
      %156 = arith.addf %arg7, %155 : vector<16x128xf32>
      %c1_i32_50 = arith.constant 1 : i32
      %157 = tpu.dynamic_rotate %150 by %c1_i32_50 dim 0 : vector<16x128xf32>, i32 -> vector<16x128xf32>
      %cst_51 = arith.constant 0.000000e+00 : f32
      %158 = vector.broadcast %cst_51 : f32 to vector<16x128xf32>
      %159 = arith.select %30, %157, %158 : vector<16x128xi1>, vector<16x128xf32>
      %160 = arith.addf %150, %159 : vector<16x128xf32>
      %c15_i32_52 = arith.constant 15 : i32
      %161 = tpu.dynamic_rotate %150 by %c15_i32_52 dim 0 : vector<16x128xf32>, i32 -> vector<16x128xf32>
      %cst_53 = arith.constant 0.000000e+00 : f32
      %162 = vector.broadcast %cst_53 : f32 to vector<16x128xf32>
      %163 = arith.select %35, %161, %162 : vector<16x128xi1>, vector<16x128xf32>
      %164 = arith.addf %160, %163 : vector<16x128xf32>
      %c1_i32_54 = arith.constant 1 : i32
      %165 = tpu.dynamic_rotate %150 by %c1_i32_54 dim 1 : vector<16x128xf32>, i32 -> vector<16x128xf32>
      %cst_55 = arith.constant 0.000000e+00 : f32
      %166 = vector.shape_cast %16 : vector<1x128xi1> to vector<1x128xi1>
      %167 = vector.broadcast %166 : vector<1x128xi1> to vector<16x128xi1>
      %168 = vector.broadcast %cst_55 : f32 to vector<16x128xf32>
      %169 = arith.select %167, %165, %168 : vector<16x128xi1>, vector<16x128xf32>
      %c127_i32_56 = arith.constant 127 : i32
      %170 = tpu.dynamic_rotate %150 by %c127_i32_56 dim 1 : vector<16x128xf32>, i32 -> vector<16x128xf32>
      %cst_57 = arith.constant 0.000000e+00 : f32
      %171 = vector.shape_cast %24 : vector<1x128xi1> to vector<1x128xi1>
      %172 = vector.broadcast %171 : vector<1x128xi1> to vector<16x128xi1>
      %173 = vector.broadcast %cst_57 : f32 to vector<16x128xf32>
      %174 = arith.select %172, %170, %173 : vector<16x128xi1>, vector<16x128xf32>
      %175 = arith.addf %164, %169 : vector<16x128xf32>
      %176 = arith.addf %175, %174 : vector<16x128xf32>
      %cst_58 = arith.constant 2.000000e-01 : f32
      %177 = vector.broadcast %cst_58 : f32 to vector<16x128xf32>
      %178 = arith.mulf %177, %176 : vector<16x128xf32>
      %cst_59 = arith.constant 5.000000e-01 : f32
      %179 = vector.broadcast %cst_59 : f32 to vector<16x128xf32>
      %180 = arith.subf %178, %179 : vector<16x128xf32>
      %cst_60 = arith.constant 0.000000e+00 : f32
      %181 = vector.broadcast %cst_60 : f32 to vector<16x128xf32>
      %182 = arith.maximumf %180, %181 : vector<16x128xf32>
      %cst_61 = arith.constant dense<0xFF800000> : vector<128xf32>
      %183 = vector.multi_reduction <maximumf>, %182, %cst_61 [0] : vector<16x128xf32> to vector<128xf32>
      %184 = vector.shape_cast %183 : vector<128xf32> to vector<1x128xf32>
      %cst_62 = arith.constant dense<0x7F800000> : vector<128xf32>
      %185 = vector.multi_reduction <minimumf>, %182, %cst_62 [0] : vector<16x128xf32> to vector<128xf32>
      %186 = vector.shape_cast %185 : vector<128xf32> to vector<1x128xf32>
      %cst_63 = arith.constant 0.000000e+00 : f32
      %187 = vector.broadcast %cst_63 : f32 to vector<1x128xf32>
      %188 = arith.subf %187, %186 : vector<1x128xf32>
      %189 = tpu.concatenate %184, %188 in 0 : vector<1x128xf32>, vector<1x128xf32> -> vector<2x128xf32>
      %c1_i32_64 = arith.constant 1 : i32
      %190 = tpu.dynamic_rotate %189 by %c1_i32_64 dim 1 : vector<2x128xf32>, i32 -> vector<2x128xf32>
      %191 = vector.shape_cast %37 : vector<1x128xi1> to vector<1x128xi1>
      %192 = vector.broadcast %191 : vector<1x128xi1> to vector<2x128xi1>
      %193 = arith.select %192, %190, %189 : vector<2x128xi1>, vector<2x128xf32>
      %c127_i32_65 = arith.constant 127 : i32
      %194 = tpu.dynamic_rotate %189 by %c127_i32_65 dim 1 : vector<2x128xf32>, i32 -> vector<2x128xf32>
      %195 = vector.shape_cast %39 : vector<1x128xi1> to vector<1x128xi1>
      %196 = vector.broadcast %195 : vector<1x128xi1> to vector<2x128xi1>
      %197 = arith.select %196, %194, %189 : vector<2x128xi1>, vector<2x128xf32>
      %198 = arith.maximumf %189, %193 : vector<2x128xf32>
      %199 = arith.maximumf %198, %197 : vector<2x128xf32>
      %c2_i32_66 = arith.constant 2 : i32
      %200 = tpu.dynamic_rotate %199 by %c2_i32_66 dim 1 : vector<2x128xf32>, i32 -> vector<2x128xf32>
      %201 = vector.shape_cast %41 : vector<1x128xi1> to vector<1x128xi1>
      %202 = vector.broadcast %201 : vector<1x128xi1> to vector<2x128xi1>
      %203 = arith.select %202, %200, %199 : vector<2x128xi1>, vector<2x128xf32>
      %c126_i32_67 = arith.constant 126 : i32
      %204 = tpu.dynamic_rotate %199 by %c126_i32_67 dim 1 : vector<2x128xf32>, i32 -> vector<2x128xf32>
      %205 = vector.shape_cast %43 : vector<1x128xi1> to vector<1x128xi1>
      %206 = vector.broadcast %205 : vector<1x128xi1> to vector<2x128xi1>
      %207 = arith.select %206, %204, %199 : vector<2x128xi1>, vector<2x128xf32>
      %208 = arith.maximumf %199, %203 : vector<2x128xf32>
      %209 = arith.maximumf %208, %207 : vector<2x128xf32>
      %c4_i32_68 = arith.constant 4 : i32
      %210 = tpu.dynamic_rotate %209 by %c4_i32_68 dim 1 : vector<2x128xf32>, i32 -> vector<2x128xf32>
      %211 = vector.shape_cast %45 : vector<1x128xi1> to vector<1x128xi1>
      %212 = vector.broadcast %211 : vector<1x128xi1> to vector<2x128xi1>
      %213 = arith.select %212, %210, %209 : vector<2x128xi1>, vector<2x128xf32>
      %c124_i32_69 = arith.constant 124 : i32
      %214 = tpu.dynamic_rotate %209 by %c124_i32_69 dim 1 : vector<2x128xf32>, i32 -> vector<2x128xf32>
      %215 = vector.shape_cast %47 : vector<1x128xi1> to vector<1x128xi1>
      %216 = vector.broadcast %215 : vector<1x128xi1> to vector<2x128xi1>
      %217 = arith.select %216, %214, %209 : vector<2x128xi1>, vector<2x128xf32>
      %218 = arith.maximumf %209, %213 : vector<2x128xf32>
      %219 = arith.maximumf %218, %217 : vector<2x128xf32>
      %c8_i32_70 = arith.constant 8 : i32
      %220 = tpu.dynamic_rotate %219 by %c8_i32_70 dim 1 : vector<2x128xf32>, i32 -> vector<2x128xf32>
      %221 = vector.shape_cast %49 : vector<1x128xi1> to vector<1x128xi1>
      %222 = vector.broadcast %221 : vector<1x128xi1> to vector<2x128xi1>
      %223 = arith.select %222, %220, %219 : vector<2x128xi1>, vector<2x128xf32>
      %c120_i32_71 = arith.constant 120 : i32
      %224 = tpu.dynamic_rotate %219 by %c120_i32_71 dim 1 : vector<2x128xf32>, i32 -> vector<2x128xf32>
      %225 = vector.shape_cast %51 : vector<1x128xi1> to vector<1x128xi1>
      %226 = vector.broadcast %225 : vector<1x128xi1> to vector<2x128xi1>
      %227 = arith.select %226, %224, %219 : vector<2x128xi1>, vector<2x128xf32>
      %228 = arith.maximumf %219, %223 : vector<2x128xf32>
      %229 = arith.maximumf %228, %227 : vector<2x128xf32>
      %230 = vector.extract_strided_slice %229 {offsets = [0, 0], sizes = [1, 128], strides = [1, 1]} : vector<2x128xf32> to vector<1x128xf32>
      %231 = vector.extract_strided_slice %229 {offsets = [1, 0], sizes = [1, 128], strides = [1, 1]} : vector<2x128xf32> to vector<1x128xf32>
      %cst_72 = arith.constant 0.000000e+00 : f32
      %232 = vector.broadcast %cst_72 : f32 to vector<1x128xf32>
      %233 = arith.subf %232, %231 : vector<1x128xf32>
      %234 = arith.subf %230, %233 : vector<1x128xf32>
      %cst_73 = arith.constant 0.000000e+00 : f32
      %235 = vector.broadcast %cst_73 : f32 to vector<1x128xf32>
      %236 = arith.cmpf one, %234, %235 : vector<1x128xf32>
      %cst_74 = arith.constant 1.000000e+00 : f32
      %237 = vector.broadcast %cst_74 : f32 to vector<1x128xf32>
      %238 = arith.select %236, %234, %237 : vector<1x128xi1>, vector<1x128xf32>
      %239 = tpu.reciprocal %238 : vector<1x128xf32> -> vector<1x128xf32>
      %240 = vector.broadcast %233 : vector<1x128xf32> to vector<16x128xf32>
      %241 = arith.subf %182, %240 : vector<16x128xf32>
      %242 = vector.broadcast %239 : vector<1x128xf32> to vector<16x128xf32>
      %243 = arith.mulf %241, %242 : vector<16x128xf32>
      %244 = vector.shape_cast %236 : vector<1x128xi1> to vector<1x128xi1>
      %245 = vector.broadcast %244 : vector<1x128xi1> to vector<16x128xi1>
      %246 = arith.select %245, %243, %182 : vector<16x128xi1>, vector<16x128xf32>
      %c1_i32_75 = arith.constant 1 : i32
      %247 = arith.addi %59, %c1_i32_75 : i32
      %248 = arith.sitofp %247 : i32 to f32
      %249 = arith.mulf %248, %248 : f32
      %250 = vector.broadcast %249 : f32 to vector<16x128xf32>
      %251 = arith.mulf %246, %250 : vector<16x128xf32>
      %252 = arith.addf %156, %251 : vector<16x128xf32>
      scf.yield %246, %252 : vector<16x128xf32>, vector<16x128xf32>
    }
    %c5_i32_17 = arith.constant 5 : i32
    %c0_18 = arith.constant 0 : index
    %c0_19 = arith.constant 0 : index
    %c0_20 = arith.constant 0 : index
    %55 = vector.load %arg4[%c0_18, %c0_19, %c0_20] : memref<1x16x128xf32, #tpu.memory_space<vmem>>, vector<1x16x128xf32>
    %56 = vector.shape_cast %55 : vector<1x16x128xf32> to vector<16x128xf32>
    %57 = vector.shape_cast %54#1 : vector<16x128xf32> to vector<1x16x128xf32>
    tpu.vector_store %arg4[%c0_18, %c0_19, %c0_20], %57 {strides = array<i32>} : memref<1x16x128xf32, #tpu.memory_space<vmem>>, vector<1x16x128xf32>,
    return
  }
  func.func @transform_0(%arg0: i32) -> (i32, i32, i32) {
    %c0_i32 = arith.constant 0 : i32
    %c0_i32_0 = arith.constant 0 : i32
    %c0_i32_1 = arith.constant 0 : i32
    return %arg0, %c0_i32, %c0_i32_0 : i32, i32, i32
  }
  func.func @transform_1(%arg0: i32) -> (i32, i32, i32) {
    %c0_i32 = arith.constant 0 : i32
    %c0_i32_0 = arith.constant 0 : i32
    %c0_i32_1 = arith.constant 0 : i32
    return %arg0, %c0_i32, %c0_i32_0 : i32, i32, i32
  }
  func.func @transform_2(%arg0: i32) -> (i32, i32) {
    %c0_i32 = arith.constant 0 : i32
    %c0_i32_0 = arith.constant 0 : i32
    %c0_i32_1 = arith.constant 0 : i32
    return %c0_i32, %c0_i32_0 : i32, i32
  }
  func.func @transform_3(%arg0: i32) -> (i32, i32, i32) {
    %c0_i32 = arith.constant 0 : i32
    %c0_i32_0 = arith.constant 0 : i32
    %c0_i32_1 = arith.constant 0 : i32
    return %arg0, %c0_i32, %c0_i32_0 : i32, i32, i32
  }
}

</mosaic_0001>

<bundles_post_ra>
// kernel: _hausdorff_er_pallas.1
= control target key start
LH: loop header
LB: loop body
LE: loop exit
PB: predicated region body
PF: predicated region fallthrough
CT: control target
= control target key end

     0   :  { %v46_v0 = vlaneseq  ;;  %s548_s14 = smov 1   ;;  %s551_s22 = smov 2   ;;  %v993_v43 = vmov 0  ;;  %v694_v51 = vmov 0.0   ;;  %v696_v52 = vmov 0.0   ;;  %s984_s2 = inlined_call_operand.vmem [shape: s32[2,128], index: 2, kind: input, shape index: {}]   ;;  %s985_s0 = inlined_call_operand.vmem [shape: f32[1,16,128], index: 0, kind: input, shape index: {}]   ;;  %s986_s1 = inlined_call_operand.vmem [shape: f32[1,16,128], index: 1, kind: input, shape index: {}]   ;;  %s987_s3 = inlined_call_operand.vmem [shape: f32[1,16,128], index: 3, kind: output, shape index: {}]  }
   0x1   :  { %v588_v1 = vld [vmem:[%s984_s2] sm:$0x3]  ;;  %v15_v5 = vld [vmem:[%s985_s0 + $0x8] sm:$0xff]  ;;  %s552_s23 = smov 124   ;;  %s553_s24 = smov 4  }
   0x2   :  { %23 = vrot.lane.b32.xlu1 %v588_v1, %s548_s14  ;;  %v592_v2 = vrot.slane %v588_v1, 1  ;;  %v594_v3 = vshrl.u32 %v46_v0, 7  ;;  %v14_v4 = vld [vmem:[%s985_s0] sm:$0xff]  ;;  %v17_v9 = vld [vmem:[%s986_s1 + $0x8] sm:$0xff]  ;;  %s549_s0 = smov 127   ;;  %s554_s25 = smov 120  }
   0x3   :  { %v16_v6 = vld [vmem:[%s986_s1] sm:$0xff]  ;;  %v20_v12 = vsub.f32 %v15_v5, %v17_v9  ;;  %s550_s1 = smov 126   ;;  %s555_s26 = smov 8  }
   0x4   :  { %27 = vrot.lane.b32.xlu0 %v592_v2, %s548_s14  ;;  %v48_v7 = vadd.s32 8, %v594_v3  ;;  %v49_v8 = vrot.slane %v594_v3, 7  ;;  %v19_v10 = vsub.f32 %v14_v4, %v16_v6  ;;  %vm992_vm0 = vcmp.lt.s32.totalorder %v594_v3, 1  ;;  %s703_s27 = smov 0  }
   0x5   :  { %v64_v11 = vrot.slane %v594_v3, 1  ;;  %vm991_vm1 = vcmp.lt.s32.totalorder %v594_v3, 7  ;;  %v22_v16 = vmul.f32 %v20_v12, %v20_v12  }
   0x6   :  { %35 = vrot.lane.b32.xlu1 %v588_v1, %s549_s0  ;;  %v50_v13 = vrot.slane %v48_v7, 7  ;;  %v65_v14 = vrot.slane %v48_v7, 1  ;;  %v615_v15 = vmul.f32 %v19_v10, %v19_v10  }
   0x8   :  { %38 = vrot.lane.b32.xlu0 %v592_v2, %s549_s0  ;;  %v52_v17 = vsel %vm992_vm0, %v49_v8, %v50_v13  ;;  %v53_v18 = vsel %vm992_vm0, %v50_v13, %v49_v8  ;;  %v67_v19 = vsel %vm991_vm1, %v64_v11, %v65_v14  ;;  %v68_v22 = vsel %vm991_vm1, %v65_v14, %v64_v11 }
   0x9   :  { %v54_v20 = vsub.s32 %v53_v18, %v594_v3  ;;  %v55_v21 = vsub.s32 %v52_v17, %v48_v7  ;;  %v69_v23 = vsub.s32 %v67_v19, %v594_v3  ;;  %v70_v24 = vsub.s32 %v68_v22, %v48_v7 }
   0xa   :  { %82 = vrot.lane.b32.xlu1 %v588_v1, %s550_s1 }
   0xb   :  { %v57_v25 = vsub.s32 0, %v54_v20  ;;  %v60_v26 = vsub.s32 0, %v55_v21  ;;  %v72_v27 = vsub.s32 0, %v69_v23  ;;  %v75_v28 = vsub.s32 0, %v70_v24 }
   0xc   :  { %79 = vrot.lane.b32.xlu0 %v588_v1, %s551_s22 }
   0xd   :  { %v630_v29 = vmin.u32 %v57_v25, %v54_v20  ;;  %v632_v30 = vmin.u32 %v60_v26, %v55_v21  ;;  %v634_v31 = vmin.u32 %v72_v27, %v69_v23  ;;  %v637_v32 = vmin.u32 %v75_v28, %v70_v24 }
   0xe   :  { %88 = vrot.lane.b32.xlu1 %v588_v1, %s552_s23 }
   0xf   :  { %vm63_vm3 = vcmp.eq.s32.totalorder %v632_v30, 1 }
  0x10   :  { %85 = vrot.lane.b32.xlu0 %v588_v1, %s553_s24 }
  0x12   :  { %94 = vrot.lane.b32.xlu1 %v588_v1, %s554_s25 }
  0x14   :  { %91 = vrot.lane.b32.xlu0 %v588_v1, %s555_s26 }
  0x74   :  { %v646_v33 = vpop.permute.xlu1 %23 }
  0x75   :  { %vm989_vm6 = vcmp.eq.s32.totalorder %v646_v33, %v588_v1 }
  0x76   :  { %v28_v34 = vpop.permute.xlu0 %27 }
  0x77   :  { %v29_v35 = vsub.s32 %v28_v34, %v592_v2 }
  0x78   :  { %v649_v36 = vpop.permute.xlu1 %35 }
  0x79   :  { %v31_v37 = vsub.s32 0, %v29_v35  ;;  %vm990_vm11 = vcmp.eq.s32.totalorder %v649_v36, %v588_v1 }
  0x7a   :  { %v39_v38 = vpop.permute.xlu0 %38 }
  0x7b   :  { %v436_v39 = vmin.u32 %v31_v37, %v29_v35  ;;  %v40_v40 = vsub.s32 %v39_v38, %v592_v2 }
  0x7c   :  { %v652_v41 = vpop.permute.xlu1 %82 }
  0x7d   :  { %vm33_vm7 = vcmp.eq.s32.totalorder %v436_v39, 1  ;;  %v42_v42 = vsub.s32 0, %v40_v40 }
  0x7e   :  { %vm661_vm9 = vmand %vm989_vm6, %vm33_vm7  ;;  %v665_v44 = vpop.permute.xlu0 %79 }
  0x7f   :  { %v994_v43 = vsel %vm661_vm9, 4294967295, %v993_v43  ;;  %v437_v45 = vmin.u32 %v42_v42, %v40_v40 }
  0x80   :  { %v669_v46 = vpop.permute.xlu1 %88 }
  0x81   :  { %vm44_vm12 = vcmp.eq.s32.totalorder %v437_v45, 1 }
  0x82   :  { %vm678_vm14 = vmand %vm990_vm11, %vm44_vm12  ;;  %v682_v48 = vpop.permute.xlu0 %85 }
  0x84   :  { %v686_v49 = vpop.permute.xlu1 %94 }
  0x86   :  { %v690_v50 = vpop.permute.xlu0 %91 }
  0x87 LB: > { %s556_s28 = smov 1   ;;  %s557_s29 = smov 127   ;;  %v108_v53 = vrot.slane %v542_v15, 7  ;;  %v109_v54 = vrot.slane %v538_v16, 7  ;;  %v116_v55 = vrot.slane %v542_v15, 1  ;;  %v117_v56 = vrot.slane %v538_v16, 1  ;;  %s546_s27 = sphi %s703_s27, %s102_s27   ;;  %v542_v15 = vphi %v615_v15, %v1039_v15   ;;  %v538_v16 = vphi %v22_v16, %v404_v16   ;;  %v534_v52 = vphi %v696_v52, %v1038_v52   ;;  %v530_v51 = vphi %v694_v51, %v1037_v51  }
  0x88   : > { %124 = vrot.lane.b32.xlu0 %v542_v15, %s556_s28  ;;  %136 = vrot.lane.b32.xlu1 %v542_v15, %s557_s29  ;;  %vm997_vm0 = vcmp.lt.s32.totalorder %v594_v3, 1  ;;  %vm998_vm2 = vcmp.eq.s32.totalorder %v630_v29, 1  ;;  %vm999_vm1 = vcmp.lt.s32.totalorder %v594_v3, 7  ;;  %vm1000_vm4 = vcmp.eq.s32.totalorder %v634_v31, 1  ;;  %s559_s30 = smov 126   ;;  %s560_s4 = smov 2  }
  0x89   : > { %v111_v57 = vsel %vm997_vm0, %v109_v54, %v108_v53  ;;  %v110_v58 = vsel %vm997_vm0, %v108_v53, %v109_v54  ;;  %v118_v60 = vsel %vm999_vm1, %v116_v55, %v117_v56  ;;  %v119_v2 = vsel %vm999_vm1, %v117_v56, %v116_v55  ;;  %s561_s5 = smov 124   ;;  %s562_s6 = smov 4  }
  0x8a   : > { %v112_v59 = vsel %vm998_vm2, %v111_v57, 0.0  ;;  %v113_v61 = vsel %vm63_vm3, %v110_v58, 0.0  ;;  %v120_v63 = vsel %vm1000_vm4, %v118_v60, 0.0  ;;  %vm1001_vm5 = vcmp.eq.s32.totalorder %v637_v32, 1  ;;  %s563_s7 = smov 120   ;;  %s564_s8 = smov 8  }
  0x8b   : > { %v114_v62 = vadd.f32 %v542_v15, %v112_v59  ;;  %v115_v0 = vadd.f32 %v538_v16, %v113_v61  ;;  %v121_v4 = vsel %vm1001_vm5, %v119_v2, 0.0  ;;  %v737_v7 = vsub.s32 0, %v594_v3  ;;  %s442_s9 = sshll.u32 %s546_s27, 1  ;;  %s102_s27 = sadd.s32 1, %s546_s27  }
  0x8c   : > { %126 = vrot.lane.b32.xlu0 %v538_v16, %s556_s28  ;;  %138 = vrot.lane.b32.xlu1 %v538_v16, %s557_s29  ;;  %v558_v8 = vmov 0   ;;  %vm1002_vm9 = vnez %v994_v43  ;;  %vm988_vm5 = vcmask 1040384   ;;  %vm1007_vm6 = vcmp.eq.s32.totalorder %v646_v33, %v588_v1  ;;  %s283_s10 = sadd.s32 1, %s442_s9  ;;  %s405_s12 = sadd.s32 2, %s442_s9 }
  0x8d   : > { %v122_v5 = vadd.f32 %v120_v63, %v114_v62  ;;  %v123_v6 = vadd.f32 %v121_v4, %v115_v0  ;;  %v128_v9 = vsel %vm1002_vm9, 1, %v558_v8  ;;  %v140_v10 = vsel %vm678_vm14, 1, %v558_v8  ;;  %s284_s11 = scvt.s32.f32 %s283_s10  ;;  %s406_s14 = scvt.s32.f32 %s405_s12 }
  0x8e   : > { %v132_v11 = vrot.slane %v128_v9, %v737_v7  ;;  %v144_v12 = vrot.slane %v140_v10, %v737_v7  ;;  %v177_v2 = vsel %vm1007_vm6, 1, %v558_v8  ;;  %vm1008_vm11 = vcmp.eq.s32.totalorder %v649_v36, %v588_v1  ;;  %p99_p0 = scmp.ge.s32.totalorder %s102_s27, 5  }
  0x8f   : > { %v186_v4 = vsel %vm1008_vm11, 1, %v558_v8  ;;  %vm1013_vm10 = vcmp.eq.s32.totalorder %v665_v44, %v588_v1  ;;  %vm1014_vm8 = vcmp.eq.s32.totalorder %v652_v41, %v588_v1  ;;  %vm1019_vm15 = vcmp.eq.s32.totalorder %v682_v48, %v588_v1  ;;  %s285_s13 = smul.f32 %s284_s11, %s284_s11 }
  0x90   : > { %vm747_vm12 = vcmp.eq.s32.totalorder %v132_v11, 1  ;;  %vm751_vm4 = vcmp.eq.s32.totalorder %v144_v12, 1  ;;  %vm1025_vm13 = vcmp.eq.s32.totalorder %v690_v50, %v588_v1  ;;  %vm1026_vm7 = vcmp.eq.s32.totalorder %v686_v49, %v588_v1  ;;  %s407_s15 = smul.f32 %s406_s14, %s406_s14 }
  0xfa   : > { %v125_v15 = vpop.permute.xlu0 %124  ;;  %v137_v16 = vpop.permute.xlu1 %136 }
  0xfb   : > { %v134_v17 = vsel %vm747_vm12, %v125_v15, 0.0  ;;  %v146_v18 = vsel %vm751_vm4, %v137_v16, 0.0 }
  0xfc   : > { %v148_v19 = vadd.f32 %v134_v17, %v122_v5  ;;  %v181_v5 = vrot.slane %v177_v2, %v737_v7 }
  0xfe   : > { %v150_v20 = vadd.f32 %v148_v19, %v146_v18  ;;  %v127_v21 = vpop.permute.xlu0 %126  ;;  %v139_v22 = vpop.permute.xlu1 %138  ;;  %vm784_vm2 = vcmp.eq.s32.totalorder %v181_v5, 1  ;;  %v197_v19 = vsel %vm1013_vm10, 1, %v558_v8 }
  0xff   : > { %v135_v23 = vsel %vm747_vm12, %v127_v21, 0.0  ;;  %v147_v24 = vsel %vm751_vm4, %v139_v22, 0.0  ;;  %v201_v21 = vrot.slane %v197_v19, %v737_v7 }
 0x100   : > { %v152_v25 = vmul.f32 0.2, %v150_v20  ;;  %v149_v26 = vadd.f32 %v135_v23, %v123_v6  ;;  %v190_v6 = vrot.slane %v186_v4, %v737_v7  ;;  %v206_v20 = vsel %vm1014_vm8, 1, %v558_v8 }
 0x101   : > { %v210_v22 = vrot.slane %v206_v20, %v737_v7  ;;  %vm808_vm6 = vcmp.eq.s32.totalorder %v201_v21, 1  ;;  %vm1020_vm8 = vcmp.eq.s32.totalorder %v669_v46, %v588_v1  ;;  %v265_v21 = vsub.s32 1, %v594_v3 }
 0x102   : > { %v151_v27 = vadd.f32 %v149_v26, %v147_v24  ;;  %v443_v28 = vadd.f32 -0.5, %v152_v25  ;;  %v286_v4 = vstv %s285_s13 }
 0x103   : > { %vm812_vm11 = vcmp.eq.s32.totalorder %v210_v22, 1 }
 0x104   : > { %v153_v34 = vmul.f32 0.2, %v151_v27  ;;  %v763_v37 = vmax.f32 %v443_v28, 0.0 }
 0x106   : > { %v444_v35 = vadd.f32 -0.5, %v153_v34 }
 0x108   : > { %v765_v38 = vmax.f32 %v444_v35, 0.0 }
 0x10a   : > { %v158_v39 = vmax.f32 %v763_v37, %v765_v38  ;;  %v165_v40 = vmin.f32 %v763_v37, %v765_v38 }
 0x10c   : > { %v159_v42 = vrot.slane %v158_v39, 4  ;;  %v166_v45 = vrot.slane %v165_v40, 4 }
 0x10e   : > { %v160_v53 = vmax.f32 %v158_v39, %v159_v42  ;;  %v167_v54 = vmin.f32 %v165_v40, %v166_v45  ;;  %v217_v39 = vsel %vm1019_vm15, 1, %v558_v8  ;;  %v226_v40 = vsel %vm1020_vm8, 1, %v558_v8 }
 0x10f   : > { %v221_v42 = vrot.slane %v217_v39, %v737_v7  ;;  %v230_v45 = vrot.slane %v226_v40, %v737_v7 }
 0x110   : > { %v161_v55 = vrot.slane %v160_v53, 2  ;;  %v168_v56 = vrot.slane %v167_v54, 2 }
 0x111   : > { %vm832_vm10 = vcmp.eq.s32.totalorder %v221_v42, 1  ;;  %vm836_vm1 = vcmp.eq.s32.totalorder %v230_v45, 1 }
 0x112   : > { %v162_v57 = vmax.f32 %v160_v53, %v161_v55  ;;  %v169_v58 = vmin.f32 %v167_v54, %v168_v56 }
 0x114   : > { %v163_v59 = vrot.slane %v162_v57, 1  ;;  %v170_v60 = vrot.slane %v169_v58, 1 }
 0x116   : > { %v171_v61 = vmin.f32 %v169_v58, %v170_v60  ;;  %v164_v62 = vmax.f32 %v162_v57, %v163_v59 }
 0x118   : > { %v172_v63 = vsub.f32 0.0, %v171_v61  ;;  %v237_v61 = vsel %vm1025_vm13, 1, %v558_v8 }
 0x11a   : > { %v174_v0 = vsel %vm988_vm5, %v164_v62, %v172_v63  ;;  %vm788_vm5 = vcmp.eq.s32.totalorder %v190_v6, 1  ;;  %v246_v62 = vsel %vm1026_vm7, 1, %v558_v8  ;;  %v241_v63 = vrot.slane %v237_v61, %v737_v7 }
 0x11b   : > { %184 = vrot.lane.b32.xlu1 %v174_v0, %s557_s29  ;;  %175 = vrot.lane.b32.xlu0 %v174_v0, %s556_s28 }
 0x11c   : > { %vm856_vm8 = vcmp.eq.s32.totalorder %v241_v63, 1 }
 0x18d   : > { %v185_v11 = vpop.permute.xlu1 %184  ;;  %v176_v12 = vpop.permute.xlu0 %175 }
 0x18e   : > { %v183_v15 = vsel %vm784_vm2, %v176_v12, %v174_v0  ;;  %v192_v17 = vsel %vm788_vm5, %v185_v11, %v174_v0 }
 0x18f   : > { %v193_v16 = vmax.f32 %v174_v0, %v183_v15  ;;  %v250_v0 = vrot.slane %v246_v62, %v737_v7 }
 0x191   : > { %v194_v18 = vmax.f32 %v193_v16, %v192_v17  ;;  %vm860_vm15 = vcmp.eq.s32.totalorder %v250_v0, 1 }
 0x193   : > { %204 = vrot.lane.b32.xlu1 %v194_v18, %s559_s30  ;;  %195 = vrot.lane.b32.xlu0 %v194_v18, %s560_s4 }
 0x205   : > { %v205_v25 = vpop.permute.xlu1 %204  ;;  %v196_v26 = vpop.permute.xlu0 %195 }
 0x206   : > { %v203_v27 = vsel %vm808_vm6, %v196_v26, %v194_v18  ;;  %v212_v34 = vsel %vm812_vm11, %v205_v25, %v194_v18 }
 0x207   : > { %v213_v28 = vmax.f32 %v194_v18, %v203_v27 }
 0x209   : > { %v214_v35 = vmax.f32 %v213_v28, %v212_v34 }
 0x20b   : > { %224 = vrot.lane.b32.xlu1 %v214_v35, %s561_s5  ;;  %215 = vrot.lane.b32.xlu0 %v214_v35, %s562_s6 }
 0x27d   : > { %v225_v55 = vpop.permute.xlu1 %224  ;;  %v216_v56 = vpop.permute.xlu0 %215 }
 0x27e   : > { %v223_v57 = vsel %vm832_vm10, %v216_v56, %v214_v35  ;;  %v232_v59 = vsel %vm836_vm1, %v225_v55, %v214_v35 }
 0x27f   : > { %v233_v58 = vmax.f32 %v214_v35, %v223_v57 }
 0x281   : > { %v234_v60 = vmax.f32 %v233_v58, %v232_v59 }
 0x283   : > { %244 = vrot.lane.b32.xlu1 %v234_v60, %s563_s7  ;;  %235 = vrot.lane.b32.xlu0 %v234_v60, %s564_s8 }
 0x2f5   : > { %v245_v5 = vpop.permute.xlu1 %244  ;;  %v236_v6 = vpop.permute.xlu0 %235 }
 0x2f6   : > { %v243_v11 = vsel %vm856_vm8, %v236_v6, %v234_v60  ;;  %v252_v15 = vsel %vm860_vm15, %v245_v5, %v234_v60 }
 0x2f7   : > { %v253_v12 = vmax.f32 %v234_v60, %v243_v11 }
 0x2f9   : > { %v254_v16 = vmax.f32 %v253_v12, %v252_v15 }
 0x2fb   : > { %v255_v17 = vsub.f32 0.0, %v254_v16 }
 0x2fd   : > { %v257_v18 = vrot.slane %v255_v17, 1  ;;  %v266_v22 = vrot.slane %v255_v17, %v265_v21 }
 0x2ff   : > { %v259_v19 = vsub.f32 %v254_v16, %v257_v18  ;;  %v267_v28 = vsub.f32 %v763_v37, %v266_v22  ;;  %v268_v34 = vsub.f32 %v765_v38, %v266_v22 }
 0x301   : > { %vm260_vm7 = vcmp.ne.f32.partialorder %v259_v19, 0.0 }
 0x302   : > { %v261_v20 = vsel %vm260_vm7, %v259_v19, 1.0  ;;  %v275_v25 = vsel %vm260_vm7, 1, %v558_v8  ;;  %vm1032_vm7 = vcmp.eq.s32.totalorder %v630_v29, 1 }
 0x303   : > { %504 = vrcp.f32 %v261_v20  ;;  %v279_v27 = vrot.slane %v275_v25, %v737_v7 }
 0x305   : > { %vm280_vm13 = vcmp.eq.s32.totalorder %v279_v27, 1 }
 0x30d   : > { %v505_v26 = vpop.eup %504 }
 0x30e   : > { %v272_v35 = vrot.slane %v505_v26, %v737_v7 }
 0x310   : > { %v273_v39 = vmul.f32 %v272_v35, %v267_v28  ;;  %v274_v40 = vmul.f32 %v272_v35, %v268_v34 }
 0x312   : > { %v877_v42 = vsel %vm280_vm13, %v274_v40, %v765_v38  ;;  %v880_v45 = vsel %vm280_vm13, %v273_v39, %v763_v37  ;;  %vm1031_vm13 = vcmp.lt.s32.totalorder %v594_v3, 7 }
 0x313   : > { %309 = vrot.lane.b32.xlu1 %v877_v42, %s556_s28  ;;  %307 = vrot.lane.b32.xlu0 %v880_v45, %s556_s28  ;;  %v291_v55 = vrot.slane %v880_v45, 7  ;;  %v292_v56 = vrot.slane %v877_v42, 7  ;;  %v299_v57 = vrot.slane %v880_v45, 1  ;;  %v300_v58 = vrot.slane %v877_v42, 1  ;;  %vm1033_vm9 = vmmov %vm1031_vm13 }
 0x315   : > { %v293_v38 = vsel %vm997_vm0, %v291_v55, %v292_v56  ;;  %v294_v37 = vsel %vm997_vm0, %v292_v56, %v291_v55  ;;  %v302_v60 = vsel %vm1031_vm13, %v300_v58, %v299_v57  ;;  %v301_v62 = vsel %vm1033_vm9, %v299_v57, %v300_v58 }
 0x316   : > { %v296_v59 = vsel %vm63_vm3, %v293_v38, 0.0  ;;  %v295_v61 = vsel %vm1032_vm7, %v294_v37, 0.0  ;;  %vm1034_vm0 = vcmp.eq.s32.totalorder %v637_v32, 1  ;;  %vm1035_vm13 = vcmp.eq.s32.totalorder %v634_v31, 1 }
 0x317   : > { %315 = vrot.lane.b32.xlu1 %v877_v42, %s557_s29  ;;  %313 = vrot.lane.b32.xlu0 %v880_v45, %s557_s29  ;;  %v298_v63 = vadd.f32 %v296_v59, %v877_v42  ;;  %v297_v0 = vadd.f32 %v295_v61, %v880_v45  ;;  %v304_v5 = vsel %vm1034_vm0, %v302_v60, 0.0  ;;  %v303_v6 = vsel %vm1035_vm13, %v301_v62, 0.0 }
 0x318   : > { %vm1036_vm0 = vcmask 1040384  }
 0x319   : > { %v306_v11 = vadd.f32 %v304_v5, %v298_v63  ;;  %v305_v12 = vadd.f32 %v303_v6, %v297_v0 }
 0x385   : > { %v310_v15 = vpop.permute.xlu1 %309  ;;  %v308_v16 = vpop.permute.xlu0 %307 }
 0x386   : > { %v312_v17 = vsel %vm747_vm12, %v310_v15, 0.0  ;;  %v311_v18 = vsel %vm747_vm12, %v308_v16, 0.0 }
 0x387   : > { %v320_v19 = vadd.f32 %v312_v17, %v306_v11  ;;  %v319_v20 = vadd.f32 %v311_v18, %v305_v12 }
 0x389   : > { %v316_v22 = vpop.permute.xlu1 %315  ;;  %v314_v25 = vpop.permute.xlu0 %313 }
 0x38a   : > { %v318_v26 = vsel %vm751_vm4, %v316_v22, 0.0  ;;  %v317_v27 = vsel %vm751_vm4, %v314_v25, 0.0 }
 0x38b   : > { %v322_v28 = vadd.f32 %v320_v19, %v318_v26  ;;  %v321_v34 = vadd.f32 %v319_v20, %v317_v27 }
 0x38d   : > { %v324_v35 = vmul.f32 0.2, %v322_v28  ;;  %v323_v39 = vmul.f32 0.2, %v321_v34 }
 0x38f   : > { %v446_v40 = vadd.f32 -0.5, %v324_v35  ;;  %v445_v55 = vadd.f32 -0.5, %v323_v39 }
 0x391   : > { %v920_v56 = vmax.f32 %v446_v40, 0.0  ;;  %v922_v13 = vmax.f32 %v445_v55, 0.0 }
 0x393   : > { %v329_v57 = vmax.f32 %v922_v13, %v920_v56  ;;  %v336_v58 = vmin.f32 %v922_v13, %v920_v56 }
 0x395   : > { %v330_v38 = vrot.slane %v329_v57, 4  ;;  %v337_v37 = vrot.slane %v336_v58, 4 }
 0x397   : > { %v331_v14 = vmax.f32 %v329_v57, %v330_v38  ;;  %v338_v59 = vmin.f32 %v336_v58, %v337_v37 }
 0x399   : > { %v332_v60 = vrot.slane %v331_v14, 2  ;;  %v339_v61 = vrot.slane %v338_v59, 2 }
 0x39b   : > { %v333_v62 = vmax.f32 %v331_v14, %v332_v60  ;;  %v340_v63 = vmin.f32 %v338_v59, %v339_v61 }
 0x39d   : > { %v334_v0 = vrot.slane %v333_v62, 1  ;;  %v341_v5 = vrot.slane %v340_v63, 1 }
 0x39f   : > { %v342_v6 = vmin.f32 %v340_v63, %v341_v5  ;;  %v335_v11 = vmax.f32 %v333_v62, %v334_v0 }
 0x3a1   : > { %v343_v12 = vsub.f32 0.0, %v342_v6 }
 0x3a3   : > { %v344_v15 = vsel %vm1036_vm0, %v335_v11, %v343_v12  ;;  %v288_v11 = vmul.f32 %v286_v4, %v877_v42  ;;  %v287_v12 = vmul.f32 %v286_v4, %v880_v45 }
 0x3a4   : > { %348 = vrot.lane.b32.xlu1 %v344_v15, %s557_s29  ;;  %345 = vrot.lane.b32.xlu0 %v344_v15, %s556_s28 }
 0x416   : > { %v349_v16 = vpop.permute.xlu1 %348  ;;  %v346_v17 = vpop.permute.xlu0 %345 }
 0x417   : > { %v347_v18 = vsel %vm784_vm2, %v346_v17, %v344_v15  ;;  %v350_v20 = vsel %vm788_vm5, %v349_v16, %v344_v15  ;;  %v289_v17 = vadd.f32 %v534_v52, %v287_v12 }
 0x418   : > { %v351_v19 = vmax.f32 %v344_v15, %v347_v18  ;;  %v408_v15 = vstv %s407_s15  ;;  %v290_v18 = vadd.f32 %v530_v51, %v288_v11 }
 0x41a   : > { %v352_v22 = vmax.f32 %v351_v19, %v350_v20 }
 0x41c   : > { %356 = vrot.lane.b32.xlu1 %v352_v22, %s559_s30  ;;  %353 = vrot.lane.b32.xlu0 %v352_v22, %s560_s4 }
 0x48e   : > { %v357_v25 = vpop.permute.xlu1 %356  ;;  %v354_v26 = vpop.permute.xlu0 %353 }
 0x48f   : > { %v355_v27 = vsel %vm808_vm6, %v354_v26, %v352_v22  ;;  %v358_v34 = vsel %vm812_vm11, %v357_v25, %v352_v22 }
 0x490   : > { %v359_v28 = vmax.f32 %v352_v22, %v355_v27 }
 0x492   : > { %v360_v9 = vmax.f32 %v359_v28, %v358_v34 }
 0x494   : > { %364 = vrot.lane.b32.xlu1 %v360_v9, %s561_s5  ;;  %361 = vrot.lane.b32.xlu0 %v360_v9, %s562_s6 }
 0x506   : > { %v365_v10 = vpop.permute.xlu1 %364  ;;  %v362_v35 = vpop.permute.xlu0 %361 }
 0x507   : > { %v363_v39 = vsel %vm832_vm10, %v362_v35, %v360_v9  ;;  %v366_v23 = vsel %vm836_vm1, %v365_v10, %v360_v9 }
 0x508   : > { %v367_v40 = vmax.f32 %v360_v9, %v363_v39 }
 0x50a   : > { %v368_v55 = vmax.f32 %v367_v40, %v366_v23 }
 0x50c   : > { %372 = vrot.lane.b32.xlu1 %v368_v55, %s563_s7  ;;  %369 = vrot.lane.b32.xlu0 %v368_v55, %s564_s8 }
 0x57e   : > { %v373_v24 = vpop.permute.xlu1 %372  ;;  %v370_v57 = vpop.permute.xlu0 %369 }
 0x57f   : > { %v371_v58 = vsel %vm856_vm8, %v370_v57, %v368_v55  ;;  %v374_v37 = vsel %vm860_vm15, %v373_v24, %v368_v55 }
 0x580   : > { %v375_v38 = vmax.f32 %v368_v55, %v371_v58 }
 0x582   : > { %v376_v53 = vmax.f32 %v375_v38, %v374_v37 }
 0x584   : > { %v377_v14 = vsub.f32 0.0, %v376_v53 }
 0x586   : > { %v379_v59 = vrot.slane %v377_v14, 1  ;;  %v388_v2 = vrot.slane %v377_v14, %v265_v21 }
 0x588   : > { %v381_v54 = vsub.f32 %v376_v53, %v379_v59  ;;  %v389_v0 = vsub.f32 %v922_v13, %v388_v2  ;;  %v390_v5 = vsub.f32 %v920_v56, %v388_v2 }
 0x58a   : > { %vm382_vm1 = vcmp.ne.f32.partialorder %v381_v54, 0.0 }
 0x58b   : > { %v383_v60 = vsel %vm382_vm1, %v381_v54, 1.0  ;;  %v397_v61 = vsel %vm382_vm1, 1, %v558_v8 }
 0x58c   : > { %506 = vrcp.f32 %v383_v60  ;;  %v401_v63 = vrot.slane %v397_v61, %v737_v7 }
 0x58e   : > { %vm402_vm2 = vcmp.eq.s32.totalorder %v401_v63, 1 }
 0x596   : > { %v507_v62 = vpop.eup %506 }
 0x597   : > { %v394_v6 = vrot.slane %v507_v62, %v737_v7 }
 0x599   : > { %v395_v16 = vmul.f32 %v394_v6, %v389_v0  ;;  %v396_v21 = vmul.f32 %v394_v6, %v390_v5 }
 0x59a   :  { %101 = sbr.rel (!%p99_p0) target bundleno = 135 (0x87), region = 39 }
 0x59b   : > { %v403_v8 = vsel %vm402_vm2, %v395_v16, %v922_v13   ;;  %v404_v16 = vsel %vm402_vm2, %v396_v21, %v920_v56  }
 0x59c   : > { %v409_v19 = vmul.f32 %v408_v15, %v403_v8  ;;  %v410_v20 = vmul.f32 %v408_v15, %v404_v16  ;;  %v1039_v15 = vmov %v403_v8 }
 0x59e   : > { %v411_v22 = vadd.f32 %v409_v19, %v289_v17   ;;  %v412_v7 = vadd.f32 %v410_v20, %v290_v18  }
 0x5a0   : > { %v1037_v51 = vmov %v412_v7  ;;  %v1038_v52 = vmov %v411_v22  ;;  %413 = vst [vmem:[%s987_s3] sm:$0xff] (%p99_p0), %v411_v22  ;;  %414 = vst [vmem:[%s987_s3 + $0x8] sm:$0xff] (%p99_p0), %v412_v7 }

</bundles_post_ra>
